<compile_context>
chip_gen: v5e
topology: v5e:2x2
jax: 0.10.0
libtpu: 0.0.40
codegen_flags: <defaults>
</compile_context>

<pallas_src>
import functools

import jax
import jax.numpy as jnp
from jax import lax
from jax.experimental import pallas as pl
from jax.experimental.pallas import tpu as pltpu


def channel_attention_kernel(x_ref, w1_ref, b1_ref, w2_ref, b2_ref, o_ref,
                             *, hw_chunk):
    """One batch tile: x_ref / o_ref are (BT, C, HW) VMEM blocks."""
    bt, c, hw = x_ref.shape
    n_chunks = hw // hw_chunk
    inv_hw = 1.0 / hw                       # static
    unroll = n_chunks <= 8

    # ---- Phase 1: chunked pooling straight off x_ref -----------------------
    # Never hold a full (BT, C, HW) temporary: each iteration touches only a
    # (BT, C, hw_chunk) slice.  Sum accumulates in f32; max stays in the
    # native dtype until the tiny (BT, C) cast.
    def pool_body(j, carry):
        s_acc, m_acc = carry
        start = pl.multiple_of(j * hw_chunk, hw_chunk)
        xc = x_ref[:, :, pl.ds(start, hw_chunk)]                   # (BT, C, T)
        s_acc = s_acc + jnp.sum(xc.astype(jnp.float32), axis=-1)
        m_acc = jnp.maximum(m_acc, jnp.max(xc, axis=-1))
        return s_acc, m_acc

    s0 = jnp.zeros((bt, c), jnp.float32)
    m0 = jnp.full((bt, c), -jnp.inf, dtype=x_ref.dtype)
    s_acc, m_acc = lax.fori_loop(0, n_chunks, pool_body, (s0, m0),
                                 unroll=unroll)

    avg_pool = s_acc * inv_hw                                      # (BT, C) f32
    max_pool = m_acc.astype(jnp.float32)                           # (BT, C) f32

    # ---- Shared MLP, fused over both pooling types (one matmul pair) -------
    pooled = jnp.concatenate([avg_pool, max_pool], axis=0)         # (2BT, C)
    h = jnp.dot(pooled, w1_ref[...], preferred_element_type=jnp.float32)
    h = jnp.maximum(h + b1_ref[...], 0.0)                          # (2BT, Cr)
    y = jnp.dot(h, w2_ref[...], preferred_element_type=jnp.float32)
    y = y + b2_ref[...]                                            # (2BT, C)

    att = jax.nn.sigmoid(y[:bt] + y[bt:])                          # (BT, C) f32
    att3 = att.astype(x_ref.dtype)[:, :, None]                     # (BT, C, 1)

    # ---- Phase 2: chunked scale, writing o_ref slice by slice --------------
    def scale_body(j, carry):
        start = pl.multiple_of(j * hw_chunk, hw_chunk)
        sl = pl.ds(start, hw_chunk)
        o_ref[:, :, sl] = (x_ref[:, :, sl] * att3).astype(o_ref.dtype)
        return carry

    lax.fori_loop(0, n_chunks, scale_body, 0, unroll=unroll)


def _hw_info():
    """(vmem_capacity_bytes, num_tensorcores) with conservative fallbacks."""
    vmem_capacity = 64 << 20            # v7x-safe default
    num_tc = 1
    try:
        vmem_capacity = int(pltpu.get_tpu_info().vmem_capacity_bytes)
    except Exception:
        pass
    try:
        kind = jax.devices()[0].device_kind.lower()
        if ("v7" in kind) or ("tpu7" in kind):
            num_tc = 2
    except Exception:
        pass
    return vmem_capacity, num_tc


def _pick_hw_chunk(HW):
    """Largest lane-dense chunk (multiple of 128) dividing HW."""
    for t in (2048, 1024, 512, 256, 128):
        if HW % t == 0:
            return t
    # TODO(synk): for real CBAM spatial sizes where HW % 128 != 0 (7x7, 14x14,
    # 28x28, 56x56) and C % 128 == 0, switch to a channels-last (B, HW, C)
    # block layout so stores stay lane-dense; here we accept masked stores.
    return HW


def _pick_batch_tile(B, C, HW, itemsize, vmem_budget_bytes, num_tc):
    """Largest batch tile whose double-buffered in+out blocks fit the budget.

    On 2-TensorCore chips prefer an even number of grid steps so both cores
    get equal work; on single-TC chips never shrink the block just to create
    extra steps (extra steps only appear when the budget forces them).
    """
    per_sample = 4 * C * HW * itemsize        # 2x double-buffering * (in + out)
    max_bt = max(1, vmem_budget_bytes // per_sample)
    # TODO(synk): if even a single (1, C, HW) sample exceeds the budget,
    # switch to a two-phase HW-tiled reduction kernel instead of relying on a
    # larger vmem_limit.
    divisors = [d for d in range(1, B + 1) if B % d == 0]
    feasible = [d for d in divisors if d <= max_bt] or [1]
    if num_tc >= 2 and B >= 2:
        even = [d for d in feasible if (B // d) % 2 == 0]
        if even:
            return max(even)
    return max(feasible)


def channel_attention(x_nchw, w1, b1, w2, b2):
    """x_nchw: (B, C, H, W). Weights (stored transposed, y = x @ W + b):
    w1 (C, Cr), b1 (Cr,), w2 (Cr, C), b2 (C,)."""
    B, C, H, W = x_nchw.shape
    Cr = w1.shape[1]
    HW = H * W
    x = x_nchw.reshape(B, C, HW)
    b1_2d = b1.reshape(1, Cr)
    b2_2d = b2.reshape(1, C)

    vmem_capacity, num_tc = _hw_info()
    block_budget = max(vmem_capacity // 3, 8 << 20)
    vmem_limit = min(vmem_capacity * 3 // 4, 2 * block_budget + (8 << 20))

    hw_chunk = _pick_hw_chunk(HW)
    BT = _pick_batch_tile(B, C, HW, x.dtype.itemsize, block_budget, num_tc)
    grid = (B // BT,)

    kernel = functools.partial(channel_attention_kernel, hw_chunk=hw_chunk)

    out = pl.pallas_call(
        kernel,
        out_shape=jax.ShapeDtypeStruct((B, C, HW), x.dtype),
        grid_spec=pltpu.PrefetchScalarGridSpec(
            num_scalar_prefetch=0,
            grid=grid,
            in_specs=[
                pl.BlockSpec((BT, C, HW), lambda b: (b, 0, 0)),  # x batch tile
                pl.BlockSpec((C, Cr), lambda b: (0, 0)),         # W1
                pl.BlockSpec((1, Cr), lambda b: (0, 0)),         # b1
                pl.BlockSpec((Cr, C), lambda b: (0, 0)),         # W2
                pl.BlockSpec((1, C), lambda b: (0, 0)),          # b2
            ],
            out_specs=pl.BlockSpec((BT, C, HW), lambda b: (b, 0, 0)),
        ),
        compiler_params=pltpu.CompilerParams(
            dimension_semantics=("parallel",),
            vmem_limit_bytes=int(vmem_limit),
        ),
    )(x, w1, b1_2d, w2, b2_2d)

    return out.reshape(B, C, H, W)


def reference(x_nchw, w1, b1, w2, b2):
    avg = jnp.mean(x_nchw, axis=(2, 3))          # (B, C)
    mx = jnp.max(x_nchw, axis=(2, 3))            # (B, C)

    def mlp(p):
        return jnp.maximum(p @ w1 + b1, 0.0) @ w2 + b2

    att = jax.nn.sigmoid(mlp(avg) + mlp(mx))     # (B, C)
    return x_nchw * att[:, :, None, None]


if __name__ == "__main__":
    # Module config: channel_in=64, reduction_ratio=16 -> hidden=4.
    # H = W = 16 so HW = 256 is lane-dense (multiple of 128).
    B, C, H, W = 4, 64, 16, 16
    Cr = C // 16

    key = jax.random.PRNGKey(0)
    kx, kw1, kb1, kw2, kb2 = jax.random.split(key, 5)

    x = jax.random.normal(kx, (B, C, H, W), dtype=jnp.float32)
    # Deterministic synthetic parameters (nn.Linear, stored transposed: y = x @ W + b)
    w1 = jax.random.normal(kw1, (C, Cr), dtype=jnp.float32) * 0.1
    b1 = jax.random.normal(kb1, (Cr,), dtype=jnp.float32) * 0.1
    w2 = jax.random.normal(kw2, (Cr, C), dtype=jnp.float32) * 0.1
    b2 = jax.random.normal(kb2, (C,), dtype=jnp.float32) * 0.1

    out = channel_attention(x, w1, b1, w2, b2)
    out = jax.block_until_ready(out)

    ref = reference(x, w1, b1, w2, b2)
    assert out.shape == (B, C, H, W)
    assert jnp.allclose(out, ref, atol=1e-4, rtol=1e-4), "mismatch vs reference"

    print("KERNEL_OK")
</pallas_src>

<mosaic_0001>
module attributes {stable_mosaic.version = 11 : i64} {
  func.func @channel_attention_kernel(%arg0: i32, %arg1: memref<4x64x256xf32, #tpu.memory_space<vmem>>, %arg2: memref<64x4xf32, #tpu.memory_space<vmem>>, %arg3: memref<1x4xf32, #tpu.memory_space<vmem>>, %arg4: memref<4x64xf32, #tpu.memory_space<vmem>>, %arg5: memref<1x64xf32, #tpu.memory_space<vmem>>, %arg6: memref<4x64x256xf32, #tpu.memory_space<vmem>>) attributes {dimension_semantics = [#tpu.dimension_semantics<parallel>], iteration_bounds = array<i64: 1>, scalar_prefetch = 0 : i64, scratch_operands = 0 : i64, tpu.core_type = #tpu.core_type<tc>, window_params = [{transform_indices = @transform_0, window_bounds = array<i64: 4, 64, 256>}, {pipeline_mode = #tpu.pipeline_mode<synchronous>, transform_indices = @transform_1, window_bounds = array<i64: 64, 4>}, {pipeline_mode = #tpu.pipeline_mode<synchronous>, transform_indices = @transform_2, window_bounds = array<i64: 1, 4>}, {pipeline_mode = #tpu.pipeline_mode<synchronous>, transform_indices = @transform_3, window_bounds = array<i64: 4, 64>}, {pipeline_mode = #tpu.pipeline_mode<synchronous>, transform_indices = @transform_4, window_bounds = array<i64: 1, 64>}, {transform_indices = @transform_5, window_bounds = array<i64: 4, 64, 256>}]} {
    %cst = arith.constant 0.000000e+00 : f32
    %0 = vector.broadcast %cst : f32 to vector<4x64xf32>
    %cst_0 = arith.constant 0xFF800000 : f32
    %1 = vector.broadcast %cst_0 : f32 to vector<4x64xf32>
    %c0_i32 = arith.constant 0 : i32
    %c256_i32 = arith.constant 256 : i32
    %2 = arith.muli %c0_i32, %c256_i32 : i32
    %3 = tpu.assume_multiple %2, 256 : i32
    %c0 = arith.constant 0 : index
    %c0_1 = arith.constant 0 : index
    %4 = arith.index_cast %3 : i32 to index
    %5 = vector.load %arg1[%c0, %c0_1, %4] : memref<4x64x256xf32, #tpu.memory_space<vmem>>, vector<4x64x256xf32>
    %cst_2 = arith.constant dense<0.000000e+00> : vector<4x64xf32>
    %6 = vector.multi_reduction <add>, %5, %cst_2 [2] : vector<4x64x256xf32> to vector<4x64xf32>
    %7 = arith.addf %0, %6 : vector<4x64xf32>
    %cst_3 = arith.constant dense<0xFF800000> : vector<4x64xf32>
    %8 = vector.multi_reduction <maximumf>, %5, %cst_3 [2] : vector<4x64x256xf32> to vector<4x64xf32>
    %9 = arith.maximumf %1, %8 : vector<4x64xf32>
    %c1_i32 = arith.constant 1 : i32
    %cst_4 = arith.constant 3.906250e-03 : f32
    %10 = vector.broadcast %cst_4 : f32 to vector<4x64xf32>
    %11 = arith.mulf %7, %10 : vector<4x64xf32>
    %12 = tpu.concatenate %11, %9 in 0 : vector<4x64xf32>, vector<4x64xf32> -> vector<8x64xf32>
    %c0_5 = arith.constant 0 : index
    %c0_6 = arith.constant 0 : index
    %13 = vector.load %arg2[%c0_5, %c0_6] : memref<64x4xf32, #tpu.memory_space<vmem>>, vector<64x4xf32>
    %cst_7 = arith.constant dense<0.000000e+00> : vector<8x4xf32>
    %14 = tpu.matmul %12, %13, %cst_7 {dimension_numbers = #tpu.dot_dimension_numbers<[1], [0], [0], [1], [0, 0, 1, 1], [], []>} : vector<8x64xf32>, vector<64x4xf32>, vector<8x4xf32> -> vector<8x4xf32>
    %c0_8 = arith.constant 0 : index
    %c0_9 = arith.constant 0 : index
    %15 = vector.load %arg3[%c0_8, %c0_9] : memref<1x4xf32, #tpu.memory_space<vmem>>, vector<1x4xf32>
    %16 = vector.broadcast %15 : vector<1x4xf32> to vector<8x4xf32>
    %17 = arith.addf %14, %16 : vector<8x4xf32>
    %cst_10 = arith.constant 0.000000e+00 : f32
    %18 = vector.broadcast %cst_10 : f32 to vector<8x4xf32>
    %19 = arith.maximumf %17, %18 : vector<8x4xf32>
    %c0_11 = arith.constant 0 : index
    %c0_12 = arith.constant 0 : index
    %20 = vector.load %arg4[%c0_11, %c0_12] : memref<4x64xf32, #tpu.memory_space<vmem>>, vector<4x64xf32>
    %cst_13 = arith.constant dense<0.000000e+00> : vector<8x64xf32>
    %21 = tpu.matmul %19, %20, %cst_13 {dimension_numbers = #tpu.dot_dimension_numbers<[1], [0], [0], [1], [0, 0, 1, 1], [], []>} : vector<8x4xf32>, vector<4x64xf32>, vector<8x64xf32> -> vector<8x64xf32>
    %c0_14 = arith.constant 0 : index
    %c0_15 = arith.constant 0 : index
    %22 = vector.load %arg5[%c0_14, %c0_15] : memref<1x64xf32, #tpu.memory_space<vmem>>, vector<1x64xf32>
    %23 = vector.broadcast %22 : vector<1x64xf32> to vector<8x64xf32>
    %24 = arith.addf %21, %23 : vector<8x64xf32>
    %25 = vector.extract_strided_slice %24 {offsets = [0, 0], sizes = [4, 64], strides = [1, 1]} : vector<8x64xf32> to vector<4x64xf32>
    %26 = vector.extract_strided_slice %24 {offsets = [4, 0], sizes = [4, 64], strides = [1, 1]} : vector<8x64xf32> to vector<4x64xf32>
    %27 = arith.addf %25, %26 : vector<4x64xf32>
    %28 = arith.negf %27 : vector<4x64xf32>
    %29 = math.exp %28 : vector<4x64xf32>
    %cst_16 = arith.constant 1.000000e+00 : f32
    %30 = vector.broadcast %cst_16 : f32 to vector<4x64xf32>
    %31 = arith.addf %30, %29 : vector<4x64xf32>
    %32 = arith.divf %30, %31 : vector<4x64xf32>
    %33 = vector.shape_cast %32 : vector<4x64xf32> to vector<4x64x1xf32>
    %c0_i32_17 = arith.constant 0 : i32
    %c256_i32_18 = arith.constant 256 : i32
    %34 = arith.muli %c0_i32_17, %c256_i32_18 : i32
    %35 = tpu.assume_multiple %34, 256 : i32
    %c0_19 = arith.constant 0 : index
    %c0_20 = arith.constant 0 : index
    %36 = arith.index_cast %35 : i32 to index
    %37 = vector.load %arg1[%c0_19, %c0_20, %36] : memref<4x64x256xf32, #tpu.memory_space<vmem>>, vector<4x64x256xf32>
    %38 = vector.broadcast %33 : vector<4x64x1xf32> to vector<4x64x256xf32>
    %39 = arith.mulf %37, %38 : vector<4x64x256xf32>
    %c0_21 = arith.constant 0 : index
    %c0_22 = arith.constant 0 : index
    %40 = arith.index_cast %35 : i32 to index
    %41 = vector.load %arg6[%c0_21, %c0_22, %40] : memref<4x64x256xf32, #tpu.memory_space<vmem>>, vector<4x64x256xf32>
    tpu.vector_store %arg6[%c0_21, %c0_22, %40], %39 {strides = array<i32>} : memref<4x64x256xf32, #tpu.memory_space<vmem>>, vector<4x64x256xf32>,
    %c1_i32_23 = arith.constant 1 : i32
    return
  }
  func.func @transform_0(%arg0: i32) -> (i32, i32, i32) {
    %c0_i32 = arith.constant 0 : i32
    %c0_i32_0 = arith.constant 0 : i32
    %c0_i32_1 = arith.constant 0 : i32
    return %arg0, %c0_i32, %c0_i32_0 : i32, i32, i32
  }
  func.func @transform_1(%arg0: i32) -> (i32, i32) {
    %c0_i32 = arith.constant 0 : i32
    %c0_i32_0 = arith.constant 0 : i32
    %c0_i32_1 = arith.constant 0 : i32
    return %c0_i32, %c0_i32_0 : i32, i32
  }
  func.func @transform_2(%arg0: i32) -> (i32, i32) {
    %c0_i32 = arith.constant 0 : i32
    %c0_i32_0 = arith.constant 0 : i32
    %c0_i32_1 = arith.constant 0 : i32
    return %c0_i32, %c0_i32_0 : i32, i32
  }
  func.func @transform_3(%arg0: i32) -> (i32, i32) {
    %c0_i32 = arith.constant 0 : i32
    %c0_i32_0 = arith.constant 0 : i32
    %c0_i32_1 = arith.constant 0 : i32
    return %c0_i32, %c0_i32_0 : i32, i32
  }
  func.func @transform_4(%arg0: i32) -> (i32, i32) {
    %c0_i32 = arith.constant 0 : i32
    %c0_i32_0 = arith.constant 0 : i32
    %c0_i32_1 = arith.constant 0 : i32
    return %c0_i32, %c0_i32_0 : i32, i32
  }
  func.func @transform_5(%arg0: i32) -> (i32, i32, i32) {
    %c0_i32 = arith.constant 0 : i32
    %c0_i32_0 = arith.constant 0 : i32
    %c0_i32_1 = arith.constant 0 : i32
    return %arg0, %c0_i32, %c0_i32_0 : i32, i32, i32
  }
}

</mosaic_0001>

<bundles_post_ra>
// kernel: tpu_custom_call.1
= control target key start
LH: loop header
LB: loop body
LE: loop exit
PB: predicated region body
PF: predicated region fallthrough
CT: control target
= control target key end

     0   :  { %10 = vsyncpa [#allocation3], 0  ;;  %s1727_s0 = inlined_call_operand.hbm [shape: f32[4,64,256], index: 0, kind: input, shape index: {}]   ;;  %s1728_s1 = inlined_call_operand.vmem [shape: f32[64,4], index: 1, kind: input, shape index: {}]   ;;  %s1729_s2 = inlined_call_operand.vmem [shape: f32[1,4], index: 2, kind: input, shape index: {}]   ;;  %s1730_s3 = inlined_call_operand.vmem [shape: f32[4,64], index: 3, kind: input, shape index: {}]   ;;  %s1731_s4 = inlined_call_operand.vmem [shape: f32[1,64], index: 4, kind: input, shape index: {}]   ;;  %s1732_s5 = inlined_call_operand.hbm [shape: f32[4,64,256], index: 5, kind: output, shape index: {}]  }
   0x1   :  { %11 = vsyncpa [#allocation4], 0  ;;  %s16_s20 = sshll.u32 %s1727_s0, 4  ;;  %s1159_s21 = smov [#allocation2]   ;;  %s17_s20 = int_to_ptr.hbm [resolvable:$true] %s16_s20 }
   0x2   :  { %s18_s22 = sshll.u32 %s1159_s21, 4  ;;  %s1160_s23 = smov 256   ;;  %s19_s22 = int_to_ptr.vmem [resolvable:$true] %s18_s22 }
   0x3   :  { %s1161_s24 = smov 16  }
   0x4   :  { %24 = dma.hbm_to_vmem [thread:$0]  %s17_s20, 8192, %s19_s22, [#allocation3], %s1160_s23, %s1160_s23, %s1161_s24  }
   0x5   :  { %1155 = dma.done.wait [#allocation3], 8192  }
   0x6   :  { %1156 = vsyncadd [#allocation3], 4294959104  ;;  %v1199_v0 = vld [vmem:[#allocation2 + $0x80] sm:$0xff]  ;;  %v54_v1 = vld [vmem:[#allocation2 + $0x88] sm:$0xff]  ;;  %vm394_vm0 = vcmask 130112   ;;  %vm398_vm1 = vcmask 195712  }
   0x7   :  { %v1201_v2 = vld [vmem:[#allocation2 + $0x20] sm:$0xff]  ;;  %v125_v3 = vadd.f32 %v54_v1, %v1199_v0  ;;  %v1204_v4 = vld [vmem:[#allocation2 + $0x28] sm:$0xff]  ;;  %v55_v9 = vld [vmem:[#allocation2 + $0x90] sm:$0xff]  ;;  %v253_v45 = vmax.f32 %v1199_v0, %v54_v1  ;;  %vm402_vm2 = vcmask 261312   ;;  %vm406_vm3 = vcmask 326912   ;;  %s995_s21 = sshll.u32 %s1732_s5, 4  ;;  %s996_s21 = int_to_ptr.hbm [resolvable:$true] %s995_s21 }
   0x8   :  { %v37_v5 = vld [vmem:[#allocation2] sm:$0xff]  ;;  %v38_v6 = vld [vmem:[#allocation2 + $0x8] sm:$0xff]  ;;  %v107_v7 = vadd.f32 %v1204_v4, %v1201_v2  ;;  %v56_v10 = vld [vmem:[#allocation2 + $0x98] sm:$0xff]  ;;  %v235_v57 = vmax.f32 %v1201_v2, %v1204_v4  ;;  %vm410_vm4 = vcmask 392512   ;;  %vm414_vm5 = vcmask 458112  }
   0x9   :  { %v101_v8 = vadd.f32 %v38_v6, %v37_v5  ;;  %126 = vadd.xlane.f32.xlu1 %v125_v3  ;;  %v1208_v11 = vld [vmem:[#allocation2 + $0xa0] sm:$0xff]  ;;  %v1210_v12 = vld [vmem:[#allocation2 + $0xa8] sm:$0xff]  ;;  %v39_v13 = vld [vmem:[#allocation2 + $0x10] sm:$0xff]  ;;  %v128_v15 = vadd.f32 %v56_v10, %v55_v9  ;;  %v229_v38 = vmax.f32 %v37_v5, %v38_v6  ;;  %v256_v43 = vmax.f32 %v55_v9, %v56_v10 }
   0xa   :  { %108 = vadd.xlane.f32.xlu2 %v107_v7  ;;  %v40_v14 = vld [vmem:[#allocation2 + $0x18] sm:$0xff]  ;;  %v131_v16 = vadd.f32 %v1210_v12, %v1208_v11  ;;  %v1214_v18 = vld [vmem:[#allocation2 + $0x110] sm:$0xff]  ;;  %v69_v22 = vld [vmem:[#allocation2 + $0x100] sm:$0xff]  ;;  %v259_v55 = vmax.f32 %v1208_v11, %v1210_v12  ;;  %vm418_vm6 = vcmask 523712   ;;  %vm465_vm7 = vcmask 1041409  }
   0xb   :  { %102 = vadd.xlane.f32.xlu0 %v101_v8  ;;  %v104_v17 = vadd.f32 %v40_v14, %v39_v13  ;;  %v1216_v19 = vld [vmem:[#allocation2 + $0x118] sm:$0xff]  ;;  %v1218_v20 = vld [vmem:[#allocation2 + $0x30] sm:$0xff]  ;;  %v70_v23 = vld [vmem:[#allocation2 + $0x108] sm:$0xff]  ;;  %v232_v39 = vmax.f32 %v39_v13, %v40_v14  ;;  %vm467_vm8 = vcmask 1042434   ;;  %vm469_vm9 = vcmask 1043459  }
   0xc   :  { %v1220_v21 = vld [vmem:[#allocation2 + $0x38] sm:$0xff]  ;;  %v152_v24 = vadd.f32 %v1216_v19, %v1214_v18  ;;  %v149_v26 = vadd.f32 %v70_v23, %v69_v22  ;;  %v1226_v27 = vld [vmem:[#allocation2 + $0x120] sm:$0xff]  ;;  %v1228_v28 = vld [vmem:[#allocation2 + $0x128] sm:$0xff]  ;;  %v277_v56 = vmax.f32 %v69_v22, %v70_v23  ;;  %v280_v0 = vmax.f32 %v1214_v18, %v1216_v19 }
   0xd   :  { %v110_v25 = vadd.f32 %v1220_v21, %v1218_v20  ;;  %v1230_v29 = vld [vmem:[#allocation2 + $0x180] sm:$0xff]  ;;  %v1232_v30 = vld [vmem:[#allocation2 + $0x188] sm:$0xff]  ;;  %v1234_v31 = vld [vmem:[#allocation2 + $0xb0] sm:$0xff]  ;;  %v155_v33 = vadd.f32 %v1228_v28, %v1226_v27  ;;  %v238_v6 = vmax.f32 %v1218_v20, %v1220_v21  ;;  %v283_v8 = vmax.f32 %v1226_v27, %v1228_v28 }
   0xe   :  { %v1236_v32 = vld [vmem:[#allocation2 + $0xb8] sm:$0xff]  ;;  %v173_v34 = vadd.f32 %v1232_v30, %v1230_v29  ;;  %v1244_v36 = vld [vmem:[#allocation2 + $0x190] sm:$0xff]  ;;  %v1250_v41 = vld [vmem:[#allocation2 + $0x40] sm:$0xff]  ;;  %v301_v9 = vmax.f32 %v1230_v29, %v1232_v30  ;;  %vm564_vm10 = vcmask 1045509   ;;  %vm566_vm11 = vcmask 1046534  }
   0xf   :  { %v134_v35 = vadd.f32 %v1236_v32, %v1234_v31  ;;  %v1246_v37 = vld [vmem:[#allocation2 + $0x198] sm:$0xff]  ;;  %v1252_v42 = vld [vmem:[#allocation2 + $0x48] sm:$0xff]  ;;  %v1257_v46 = vld [vmem:[#allocation2 + $0x1a0] sm:$0xff]  ;;  %v262_v10 = vmax.f32 %v1234_v31, %v1236_v32  ;;  %vm568_vm12 = vcmask 1047559   ;;  %vm571_vm13 = vcmask 1043456  }
  0x10   :  { %v176_v40 = vadd.f32 %v1246_v37, %v1244_v36  ;;  %v113_v44 = vadd.f32 %v1252_v42, %v1250_v41  ;;  %v1259_v47 = vld [vmem:[#allocation2 + $0x130] sm:$0xff]  ;;  %v1261_v48 = vld [vmem:[#allocation2 + $0x138] sm:$0xff]  ;;  %v1263_v49 = vld [vmem:[#allocation2 + $0x1a8] sm:$0xff]  ;;  %v241_v23 = vmax.f32 %v1250_v41, %v1252_v42  ;;  %vm585_vm14 = vcmask 523264  }
  0x11   :  { %129 = vadd.xlane.f32.xlu1 %v128_v15  ;;  %v1265_v50 = vld [vmem:[#allocation2 + $0xc0] sm:$0xff]  ;;  %v1267_v51 = vld [vmem:[#allocation2 + $0xc8] sm:$0xff]  ;;  %v158_v52 = vadd.f32 %v1261_v48, %v1259_v47  ;;  %v179_v53 = vadd.f32 %v1263_v49, %v1257_v46  ;;  %v1279_v58 = vld [vmem:[#allocation2 + $0x50] sm:$0xff]  ;;  %vm615_vm15 = vcmask 31744  }
  0x12   :  { %132 = vadd.xlane.f32.xlu2 %v131_v16  ;;  %v137_v54 = vadd.f32 %v1267_v51, %v1265_v50  ;;  %v1281_v59 = vld [vmem:[#allocation2 + $0x58] sm:$0xff]  ;;  %v1283_v60 = vld [vmem:[#allocation2 + $0xd0] sm:$0xff]  ;;  %v1297_v3 = vld [vmem:[#allocation2 + $0x140] sm:$0xff]  ;;  %v265_v27 = vmax.f32 %v1265_v50, %v1267_v51 }
  0x13   :  { %105 = vadd.xlane.f32.xlu0 %v104_v17  ;;  %v1285_v61 = vld [vmem:[#allocation2 + $0xd8] sm:$0xff]  ;;  %v116_v62 = vadd.f32 %v1281_v59, %v1279_v58  ;;  %v1293_v1 = vld [vmem:[#allocation2 + $0x1b0] sm:$0xff]  ;;  %v1299_v4 = vld [vmem:[#allocation2 + $0x148] sm:$0xff]  ;;  %v304_v17 = vmax.f32 %v1244_v36, %v1246_v37 }
  0x14   :  { %v140_v63 = vadd.f32 %v1285_v61, %v1283_v60  ;;  %v1295_v2 = vld [vmem:[#allocation2 + $0x1b8] sm:$0xff]  ;;  %v161_v7 = vadd.f32 %v1299_v4, %v1297_v3  ;;  %v1313_v11 = vld [vmem:[#allocation2 + $0x60] sm:$0xff]  ;;  %v1315_v12 = vld [vmem:[#allocation2 + $0x68] sm:$0xff] }
  0x15   :  { %v182_v5 = vadd.f32 %v1295_v2, %v1293_v1  ;;  %v1317_v13 = vld [vmem:[#allocation2 + $0xe0] sm:$0xff]  ;;  %v1319_v14 = vld [vmem:[#allocation2 + $0xe8] sm:$0xff]  ;;  %v119_v15 = vadd.f32 %v1315_v12, %v1313_v11  ;;  %v1331_v20 = vld [vmem:[#allocation2 + $0x150] sm:$0xff] }
  0x16   :  { %v143_v16 = vadd.f32 %v1319_v14, %v1317_v13  ;;  %v1327_v18 = vld [vmem:[#allocation2 + $0x1c0] sm:$0xff]  ;;  %v1329_v19 = vld [vmem:[#allocation2 + $0x1c8] sm:$0xff]  ;;  %v1333_v21 = vld [vmem:[#allocation2 + $0x158] sm:$0xff] }
  0x17   :  { %v185_v22 = vadd.f32 %v1329_v19, %v1327_v18  ;;  %v1347_v28 = vld [vmem:[#allocation2 + $0x160] sm:$0xff]  ;;  %v1349_v29 = vld [vmem:[#allocation2 + $0xf0] sm:$0xff]  ;;  %v1351_v30 = vld [vmem:[#allocation2 + $0xf8] sm:$0xff] }
  0x18   :  { %v1353_v31 = vld [vmem:[#allocation2 + $0x168] sm:$0xff]  ;;  %v1355_v32 = vld [vmem:[#allocation2 + $0x70] sm:$0xff]  ;;  %v1383_v50 = vld [vmem:[#allocation2 + $0x178] sm:$0xff] }
  0x19   :  { %153 = vadd.xlane.f32.xlu1 %v152_v24  ;;  %v164_v24 = vadd.f32 %v1333_v21, %v1331_v20  ;;  %v1365_v37 = vld [vmem:[#allocation2 + $0x1d0] sm:$0xff] }
  0x1a   :  { %111 = vadd.xlane.f32.xlu2 %v110_v25  ;;  %v286_v25 = vmax.f32 %v1259_v47, %v1261_v48 }
  0x1b   :  { %150 = vadd.xlane.f32.xlu0 %v149_v26  ;;  %v307_v26 = vmax.f32 %v1257_v46, %v1263_v49  ;;  %v1381_v49 = vld [vmem:[#allocation2 + $0x170] sm:$0xff] }
  0x21   :  { %156 = vadd.xlane.f32.xlu1 %v155_v33  ;;  %v1357_v33 = vld [vmem:[#allocation2 + $0x78] sm:$0xff] }
  0x22   :  { %174 = vadd.xlane.f32.xlu2 %v173_v34  ;;  %v146_v34 = vadd.f32 %v1351_v30, %v1349_v29  ;;  %v122_v36 = vadd.f32 %v1357_v33, %v1355_v32 }
  0x23   :  { %135 = vadd.xlane.f32.xlu0 %v134_v35  ;;  %v167_v35 = vadd.f32 %v1353_v31, %v1347_v28 }
  0x29   :  { %230 = vmax.xlane.f32.xlu1 %v229_v38  ;;  %v1367_v38 = vld [vmem:[#allocation2 + $0x1d8] sm:$0xff] }
  0x2a   :  { %233 = vmax.xlane.f32.xlu2 %v232_v39 }
  0x2b   :  { %177 = vadd.xlane.f32.xlu0 %v176_v40  ;;  %v389_v40 = vlaneseq }
  0x2d   :  { %v1376_v46 = vand.u32 127, %v389_v40 }
  0x2f   :  { %v1379_v48 = vadd.s32 4294967288, %v1376_v46  ;;  %v1386_v51 = vadd.s32 4294967280, %v1376_v46 }
  0x31   :  { %257 = vmax.xlane.f32.xlu1 %v256_v43  ;;  %v244_v43 = vmax.f32 %v1279_v58, %v1281_v59 }
  0x32   :  { %114 = vadd.xlane.f32.xlu2 %v113_v44  ;;  %v268_v44 = vmax.f32 %v1283_v60, %v1285_v61  ;;  %v310_v61 = vmax.f32 %v1293_v1, %v1295_v2 }
  0x33   :  { %254 = vmax.xlane.f32.xlu0 %v253_v45  ;;  %v188_v45 = vadd.f32 %v1367_v38, %v1365_v37 }
  0x39   :  { %159 = vadd.xlane.f32.xlu1 %v158_v52 }
  0x3a   :  { %180 = vadd.xlane.f32.xlu2 %v179_v53 }
  0x3b   :  { %138 = vadd.xlane.f32.xlu0 %v137_v54 }
  0x41   :  { %260 = vmax.xlane.f32.xlu1 %v259_v55 }
  0x42   :  { %278 = vmax.xlane.f32.xlu2 %v277_v56 }
  0x43   :  { %236 = vmax.xlane.f32.xlu0 %v235_v57 }
  0x49   :  { %117 = vadd.xlane.f32.xlu1 %v116_v62 }
  0x4a   :  { %141 = vadd.xlane.f32.xlu2 %v140_v63 }
  0x4b   :  { %281 = vmax.xlane.f32.xlu0 %v280_v0  ;;  %v170_v0 = vadd.f32 %v1383_v50, %v1381_v49 }
  0x51   :  { %183 = vadd.xlane.f32.xlu1 %v182_v5  ;;  %v289_v5 = vmax.f32 %v1297_v3, %v1299_v4  ;;  %v1404_v4 = vld [vmem:[#allocation2 + $0x1e0] sm:$0xff] }
  0x52   :  { %239 = vmax.xlane.f32.xlu2 %v238_v6 }
  0x53   :  { %162 = vadd.xlane.f32.xlu0 %v161_v7 }
  0x59   :  { %284 = vmax.xlane.f32.xlu1 %v283_v8 }
  0x5a   :  { %302 = vmax.xlane.f32.xlu2 %v301_v9 }
  0x5b   :  { %263 = vmax.xlane.f32.xlu0 %v262_v10 }
  0x61   :  { %120 = vadd.xlane.f32.xlu1 %v119_v15 }
  0x62   :  { %144 = vadd.xlane.f32.xlu2 %v143_v16  ;;  %v1406_v16 = vld [vmem:[#allocation2 + $0x1e8] sm:$0xff] }
  0x63   :  { %305 = vmax.xlane.f32.xlu0 %v304_v17 }
  0x69   :  { %186 = vadd.xlane.f32.xlu1 %v185_v22  ;;  %v1409_v22 = vadd.s32 4294967272, %v1376_v46 }
  0x6a   :  { %242 = vmax.xlane.f32.xlu2 %v241_v23 }
  0x6b   :  { %165 = vadd.xlane.f32.xlu0 %v164_v24 }
  0x71   :  { %287 = vmax.xlane.f32.xlu1 %v286_v25 }
  0x72   :  { %308 = vmax.xlane.f32.xlu2 %v307_v26  ;;  %v247_v26 = vmax.f32 %v1313_v11, %v1315_v12 }
  0x73   :  { %266 = vmax.xlane.f32.xlu0 %v265_v27 }
  0x79   :  { %147 = vadd.xlane.f32.xlu1 %v146_v34 }
  0x7a   :  { %168 = vadd.xlane.f32.xlu2 %v167_v35  ;;  %v271_v35 = vmax.f32 %v1317_v13, %v1319_v14 }
  0x7b   :  { %123 = vadd.xlane.f32.xlu0 %v122_v36  ;;  %v191_v36 = vadd.f32 %v1406_v16, %v1404_v4 }
  0x7c   :  { %v127_v39 = vpop.xlane.xlu1 %126 }
  0x7d   :  { %v109_v41 = vpop.xlane.xlu2 %108  ;;  %v333_v47 = vmul.f32 0.00390625, %v127_v39 }
  0x7e   :  { %v103_v42 = vpop.xlane.xlu0 %102  ;;  %v327_v55 = vmul.f32 0.00390625, %v109_v41 }
  0x7f   :  { %v325_v52 = vmul.f32 0.00390625, %v103_v42  ;;  %v420_v54 = vperm.slane %v333_v47, %v1376_v46  ;;  %v1424_v47 = vld [vmem:[#allocation2 + $0x1f8] sm:$0xff] }
  0x80   :  { %v397_v10 = vperm.slane %v327_v55, %v1386_v51 }
  0x81   :  { %245 = vmax.xlane.f32.xlu1 %v244_v43  ;;  %v391_v7 = vperm.slane %v325_v52, %v1376_v46 }
  0x82   :  { %269 = vmax.xlane.f32.xlu2 %v268_v44 }
  0x83   :  { %189 = vadd.xlane.f32.xlu0 %v188_v45  ;;  %v1422_v45 = vld [vmem:[#allocation2 + $0x1f0] sm:$0xff] }
  0x84   :  { %v130_v53 = vpop.xlane.xlu1 %129 }
  0x85   :  { %v334_v56 = vmul.f32 0.00390625, %v130_v53  ;;  %v133_v57 = vpop.xlane.xlu2 %132 }
  0x86   :  { %v106_v60 = vpop.xlane.xlu0 %105  ;;  %v335_v62 = vmul.f32 0.00390625, %v133_v57 }
  0x87   :  { %v326_v63 = vmul.f32 0.00390625, %v106_v60  ;;  %v421_v6 = vperm.slane %v334_v56, %v1379_v48  ;;  %v313_v56 = vmax.f32 %v1327_v18, %v1329_v19  ;;  %v194_v60 = vadd.f32 %v1424_v47, %v1422_v45 }
  0x88   :  { %v423_v8 = vperm.slane %v335_v62, %v1386_v51 }
  0x89   :  { %v393_v9 = vperm.slane %v326_v63, %v1379_v48  ;;  %v422_v1 = vsel %vm394_vm0, %v421_v6, %v420_v54  ;;  %311 = vmax.xlane.f32.xlu1 %v310_v61  ;;  %v292_v61 = vmax.f32 %v1331_v20, %v1333_v21  ;;  %v295_v20 = vmax.f32 %v1347_v28, %v1353_v31 }
  0x8a   :  { %v424_v2 = vsel %vm398_vm1, %v423_v8, %v422_v1  ;;  %171 = vadd.xlane.f32.xlu2 %v170_v0  ;;  %v274_v21 = vmax.f32 %v1349_v29, %v1351_v30  ;;  %v1449_v28 = vadd.s32 4294967264, %v1376_v46 }
  0x8b   :  { %v395_v15 = vsel %vm394_vm0, %v393_v9, %v391_v7  ;;  %290 = vmax.xlane.f32.xlu0 %v289_v5 }
  0x8c   :  { %v399_v3 = vsel %vm398_vm1, %v397_v10, %v395_v15  ;;  %v154_v17 = vpop.xlane.xlu1 %153 }
  0x8d   :  { %v342_v23 = vmul.f32 0.00390625, %v154_v17  ;;  %v112_v24 = vpop.xlane.xlu2 %111 }
  0x8e   :  { %v151_v25 = vpop.xlane.xlu0 %150  ;;  %v328_v27 = vmul.f32 0.00390625, %v112_v24 }
  0x8f   :  { %v341_v34 = vmul.f32 0.00390625, %v151_v25  ;;  %v436_v39 = vperm.slane %v342_v23, %v1379_v48 }
  0x90   :  { %v401_v41 = vperm.slane %v328_v27, %v1409_v22 }
  0x91   :  { %v435_v42 = vperm.slane %v341_v34, %v1376_v46  ;;  %248 = vmax.xlane.f32.xlu1 %v247_v26  ;;  %v298_v26 = vmax.f32 %v1381_v49, %v1383_v50 }
  0x92   :  { %v403_v43 = vsel %vm402_vm2, %v401_v41, %v399_v3  ;;  %272 = vmax.xlane.f32.xlu2 %v271_v35  ;;  %v316_v35 = vmax.f32 %v1365_v37, %v1367_v38 }
  0x93   :  { %v437_v44 = vsel %vm394_vm0, %v436_v39, %v435_v42  ;;  %192 = vadd.xlane.f32.xlu0 %v191_v36  ;;  %v319_v36 = vmax.f32 %v1404_v4, %v1406_v16 }
  0x94   :  { %v157_v52 = vpop.xlane.xlu1 %156 }
  0x95   :  { %v343_v53 = vmul.f32 0.00390625, %v157_v52  ;;  %v175_v54 = vpop.xlane.xlu2 %174 }
  0x96   :  { %v136_v55 = vpop.xlane.xlu0 %135  ;;  %v349_v5 = vmul.f32 0.00390625, %v175_v54 }
  0x97   :  { %v336_v57 = vmul.f32 0.00390625, %v136_v55  ;;  %v438_v62 = vperm.slane %v343_v53, %v1386_v51  ;;  %v322_v55 = vmax.f32 %v1422_v45, %v1424_v47 }
  0x98   :  { %v450_v9 = vperm.slane %v349_v5, %v1376_v46 }
  0x99   :  { %v425_v63 = vperm.slane %v336_v57, %v1409_v22  ;;  %v439_v0 = vsel %vm398_vm1, %v438_v62, %v437_v44  ;;  %314 = vmax.xlane.f32.xlu1 %v313_v56 }
  0x9a   :  { %195 = vadd.xlane.f32.xlu2 %v194_v60 }
  0x9b   :  { %v426_v6 = vsel %vm402_vm2, %v425_v63, %v424_v2  ;;  %293 = vmax.xlane.f32.xlu0 %v292_v61  ;;  %v250_v2 = vmax.f32 %v1355_v32, %v1357_v33 }
  0x9c   :  { %v231_v18 = vpop.xlane.xlu1 %230 }
  0x9d   :  { %v234_v19 = vpop.xlane.xlu2 %233  ;;  %v504_v7 = vperm.slane %v231_v18, %v1376_v46 }
  0x9e   :  { %v178_v8 = vpop.xlane.xlu0 %177  ;;  %v505_v10 = vperm.slane %v234_v19, %v1379_v48  ;;  %v1475_v19 = vadd.s32 4294967256, %v1376_v46 }
  0x9f   :  { %v350_v1 = vmul.f32 0.00390625, %v178_v8 }
  0xa0   :  { %v506_v15 = vsel %vm394_vm0, %v505_v10, %v504_v7 }
  0xa1   :  { %v451_v3 = vperm.slane %v350_v1, %v1379_v48  ;;  %275 = vmax.xlane.f32.xlu1 %v274_v21 }
  0xa2   :  { %296 = vmax.xlane.f32.xlu2 %v295_v20 }
  0xa3   :  { %v452_v17 = vsel %vm394_vm0, %v451_v3, %v450_v9  ;;  %251 = vmax.xlane.f32.xlu0 %v250_v2 }
  0xa4   :  { %v258_v31 = vpop.xlane.xlu1 %257 }
  0xa5   :  { %v115_v23 = vpop.xlane.xlu2 %114  ;;  %v520_v24 = vperm.slane %v258_v31, %v1379_v48 }
  0xa6   :  { %v255_v25 = vpop.xlane.xlu0 %254  ;;  %v329_v27 = vmul.f32 0.00390625, %v115_v23 }
  0xa7   :  { %v519_v34 = vperm.slane %v255_v25, %v1376_v46 }
  0xa8   :  { %v405_v39 = vperm.slane %v329_v27, %v1449_v28 }
  0xa9   :  { %v521_v41 = vsel %vm394_vm0, %v520_v24, %v519_v34  ;;  %299 = vmax.xlane.f32.xlu1 %v298_v26 }
  0xaa   :  { %v407_v42 = vsel %vm406_vm3, %v405_v39, %v403_v43  ;;  %320 = vmax.xlane.f32.xlu2 %v319_v36 }
  0xab   :  { %317 = vmax.xlane.f32.xlu0 %v316_v35 }
  0xac   :  { %v160_v49 = vpop.xlane.xlu1 %159 }
  0xad   :  { %v181_v50 = vpop.xlane.xlu2 %180  ;;  %v344_v44 = vmul.f32 0.00390625, %v160_v49 }
  0xae   :  { %v139_v52 = vpop.xlane.xlu0 %138  ;;  %v351_v53 = vmul.f32 0.00390625, %v181_v50 }
  0xaf   :  { %v337_v54 = vmul.f32 0.00390625, %v139_v52  ;;  %v440_v4 = vperm.slane %v344_v44, %v1409_v22 }
  0xb0   :  { %v453_v16 = vperm.slane %v351_v53, %v1386_v51 }
  0xb1   :  { %v427_v56 = vperm.slane %v337_v54, %v1449_v28  ;;  %v441_v57 = vsel %vm402_vm2, %v440_v4, %v439_v0  ;;  %v1503_v54 = vadd.s32 4294967248, %v1376_v46 }
  0xb2   :  { %v454_v43 = vsel %vm398_vm1, %v453_v16, %v452_v17 }
  0xb3   :  { %v428_v60 = vsel %vm406_vm3, %v427_v56, %v426_v6  ;;  %323 = vmax.xlane.f32.xlu0 %v322_v55 }
  0xb4   :  { %v261_v61 = vpop.xlane.xlu1 %260 }
  0xb5   :  { %v279_v62 = vpop.xlane.xlu2 %278  ;;  %v522_v63 = vperm.slane %v261_v61, %v1386_v51 }
  0xb6   :  { %v237_v5 = vpop.xlane.xlu0 %236  ;;  %v534_v0 = vperm.slane %v279_v62, %v1376_v46 }
  0xb7   :  { %v507_v45 = vperm.slane %v237_v5, %v1386_v51  ;;  %v523_v47 = vsel %vm398_vm1, %v522_v63, %v521_v41 }
  0xb9   :  { %v508_v18 = vsel %vm398_vm1, %v507_v45, %v506_v15 }
  0xbc   :  { %v118_v7 = vpop.xlane.xlu1 %117 }
  0xbd   :  { %v142_v8 = vpop.xlane.xlu2 %141  ;;  %v330_v6 = vmul.f32 0.00390625, %v118_v7 }
  0xbe   :  { %v282_v20 = vpop.xlane.xlu0 %281  ;;  %v338_v21 = vmul.f32 0.00390625, %v142_v8 }
  0xbf   :  { %v535_v9 = vperm.slane %v282_v20, %v1379_v48  ;;  %v409_v10 = vperm.slane %v330_v6, %v1475_v19 }
  0xc0   :  { %v429_v1 = vperm.slane %v338_v21, %v1475_v19 }
  0xc1   :  { %v536_v2 = vsel %vm394_vm0, %v535_v9, %v534_v0  ;;  %v411_v15 = vsel %vm410_vm4, %v409_v10, %v407_v42  ;;  %v1525_v9 = vadd.s32 4294967240, %v1376_v46 }
  0xc2   :  { %v430_v3 = vsel %vm410_vm4, %v429_v1, %v428_v60 }
  0xc4   :  { %v184_v17 = vpop.xlane.xlu1 %183 }
  0xc5   :  { %v240_v31 = vpop.xlane.xlu2 %239  ;;  %v352_v23 = vmul.f32 0.00390625, %v184_v17 }
  0xc6   :  { %v163_v24 = vpop.xlane.xlu0 %162  ;;  %v509_v25 = vperm.slane %v240_v31, %v1409_v22 }
  0xc7   :  { %v345_v26 = vmul.f32 0.00390625, %v163_v24  ;;  %v455_v27 = vperm.slane %v352_v23, %v1409_v22 }
  0xc8   :  { %v1487_v34 = vsel %vm402_vm2, %v509_v25, %v508_v18 }
  0xc9   :  { %v442_v35 = vperm.slane %v345_v26, %v1449_v28  ;;  %v1491_v36 = vsel %vm402_vm2, %v455_v27, %v454_v43 }
  0xcb   :  { %v443_v39 = vsel %vm406_vm3, %v442_v35, %v441_v57 }
  0xcc   :  { %v285_v41 = vpop.xlane.xlu1 %284 }
  0xcd   :  { %v303_v42 = vpop.xlane.xlu2 %302  ;;  %v537_v49 = vperm.slane %v285_v41, %v1386_v51 }
  0xce   :  { %v264_v50 = vpop.xlane.xlu0 %263  ;;  %v549_v55 = vperm.slane %v303_v42, %v1376_v46 }
  0xcf   :  { %v524_v44 = vperm.slane %v264_v50, %v1409_v22  ;;  %v1497_v52 = vsel %vm398_vm1, %v537_v49, %v536_v2 }
  0xd1   :  { %v1500_v53 = vsel %vm402_vm2, %v524_v44, %v523_v47  ;;  %v579_v44 = vld [vmem:[%s1728_s1 + $0x30] sm:$0xff] }
  0xd4   :  { %v121_v4 = vpop.xlane.xlu1 %120 }
  0xd5   :  { %v145_v16 = vpop.xlane.xlu2 %144  ;;  %v331_v56 = vmul.f32 0.00390625, %v121_v4  ;;  %v578_v4 = vld [vmem:[%s1728_s1 + $0x28] sm:$0xff] }
  0xd6   :  { %v306_v57 = vpop.xlane.xlu0 %305  ;;  %v339_v43 = vmul.f32 0.00390625, %v145_v16 }
  0xd7   :  { %v550_v60 = vperm.slane %v306_v57, %v1379_v48  ;;  %v413_v61 = vperm.slane %v331_v56, %v1503_v54  ;;  %v577_v57 = vld [vmem:[%s1728_s1 + $0x20] sm:$0xff] }
  0xd8   :  { %v431_v62 = vperm.slane %v339_v43, %v1503_v54  ;;  %v576_v43 = vld [vmem:[%s1728_s1 + $0x18] sm:$0xff] }
  0xd9   :  { %v1510_v63 = vsel %vm394_vm0, %v550_v60, %v549_v55  ;;  %v415_v5 = vsel %vm414_vm5, %v413_v61, %v411_v15 }
  0xda   :  { %v432_v45 = vsel %vm414_vm5, %v431_v62, %v430_v3 }
  0xdc   :  { %v187_v47 = vpop.xlane.xlu1 %186 }
  0xdd   :  { %v1514_v18 = vpop.xlane.xlu2 %242 }
  0xde   :  { %v166_v0 = vpop.xlane.xlu0 %165 }
  0xdf   :  { %v346_v7 = vmul.f32 0.00390625, %v166_v0  ;;  %v575_v0 = vld [vmem:[%s1728_s1 + $0x10] sm:$0xff] }
  0xe1   :  { %v444_v8 = vperm.slane %v346_v7, %v1475_v19  ;;  %v353_v7 = vmul.f32 0.00390625, %v187_v47 }
  0xe3   :  { %v445_v48 = vsel %vm410_vm4, %v444_v8, %v443_v39  ;;  %v580_v39 = vld [vmem:[%s1728_s1 + $0x38] sm:$0xff]  ;;  %v574_v8 = vld [vmem:[%s1728_s1 + $0x8] sm:$0xff] }
  0xe4   :  { %v1518_v6 = vpop.xlane.xlu1 %287  ;;  %597 = vmatpush.msra.mxu0 %v580_v39  ;;  %v511_v39 = vperm.slane %v1514_v18, %v1449_v28 }
  0xe5   :  { %v1520_v20 = vpop.xlane.xlu2 %308 }
  0xe6   :  { %v1522_v21 = vpop.xlane.xlu0 %266  ;;  %598 = vmatpush.msra.mxu0 %v579_v44  ;;  %v512_v18 = vsel %vm406_vm3, %v511_v39, %v1487_v34 }
  0xe8   :  { %599 = vmatpush.msra.mxu0 %v578_v4 }
  0xea   :  { %600 = vmatpush.msra.mxu0 %v577_v57 }
  0xec   :  { %v148_v10 = vpop.xlane.xlu1 %147  ;;  %601 = vmatpush.msra.mxu0 %v576_v43 }
  0xed   :  { %v169_v1 = vpop.xlane.xlu2 %168  ;;  %v340_v2 = vmul.f32 0.00390625, %v148_v10  ;;  %v573_v10 = vld [vmem:[%s1728_s1] sm:$0xff] }
  0xee   :  { %v124_v15 = vpop.xlane.xlu0 %123  ;;  %v347_v35 = vmul.f32 0.00390625, %v169_v1  ;;  %602 = vmatpush.msra.mxu0 %v575_v0 }
  0xef   :  { %v332_v3 = vmul.f32 0.00390625, %v124_v15  ;;  %v433_v17 = vperm.slane %v340_v2, %v1525_v9  ;;  %v457_v2 = vperm.slane %v353_v7, %v1449_v28 }
  0xf0   :  { %v446_v42 = vperm.slane %v347_v35, %v1503_v54  ;;  %603 = vmatpush.msra.mxu0 %v574_v8 }
  0xf1   :  { %v417_v31 = vperm.slane %v332_v3, %v1525_v9  ;;  %v434_v23 = vsel %vm418_vm6, %v433_v17, %v432_v45 }
  0xf2   :  { %v447_v56 = vsel %vm414_vm5, %v446_v42, %v445_v48  ;;  %604 = vmatpush.msra.mxu0 %v573_v10 }
  0xf3   :  { %v419_v24 = vsel %vm418_vm6, %v417_v31, %v415_v5 }
  0xf4   :  { %v466_v25 = vsel %vm465_vm7, %v434_v23, %v419_v24  ;;  %v1531_v26 = vpop.xlane.xlu1 %245  ;;  %v458_v24 = vsel %vm406_vm3, %v457_v2, %v1491_v36  ;;  %v552_v2 = vperm.slane %v1520_v20, %v1386_v51 }
  0xf5   :  { %v270_v46 = vpop.xlane.xlu2 %269  ;;  %v513_v44 = vperm.slane %v1531_v26, %v1475_v19 }
  0xf6   :  { %v190_v27 = vpop.xlane.xlu0 %189  ;;  %v528_v42 = vperm.slane %v270_v46, %v1475_v19  ;;  %v553_v51 = vsel %vm398_vm1, %v552_v2, %v1510_v63 }
  0xf7   :  { %v354_v48 = vmul.f32 0.00390625, %v190_v27  ;;  %v514_v26 = vsel %vm410_vm4, %v513_v44, %v512_v18 }
  0xf9   :  { %v459_v15 = vperm.slane %v354_v48, %v1475_v19 }
  0xfb   :  { %v460_v27 = vsel %vm410_vm4, %v459_v15, %v458_v24 }
  0xfc   :  { %v1536_v41 = vpop.xlane.xlu1 %311 }
  0xfd   :  { %v172_v49 = vpop.xlane.xlu2 %171 }
  0xfe   :  { %v1539_v50 = vpop.xlane.xlu0 %290  ;;  %v348_v55 = vmul.f32 0.00390625, %v172_v49 }
 0x100   :  { %v448_v16 = vperm.slane %v348_v55, %v1525_v9 }
 0x102   :  { %v449_v60 = vsel %vm418_vm6, %v448_v16, %v447_v56 }
 0x103   :  { %v468_v61 = vsel %vm467_vm8, %v449_v60, %v466_v25  ;;  %v526_v25 = vperm.slane %v1522_v21, %v1449_v28 }
 0x104   :  { %v249_v62 = vpop.xlane.xlu1 %248 }
 0x105   :  { %v273_v5 = vpop.xlane.xlu2 %272  ;;  %v515_v21 = vperm.slane %v249_v62, %v1503_v54  ;;  %v527_v16 = vsel %vm406_vm3, %v526_v25, %v1500_v53  ;;  %v539_v53 = vperm.slane %v1518_v6, %v1409_v22 }
 0x106   :  { %v193_v45 = vpop.xlane.xlu0 %192  ;;  %v530_v36 = vperm.slane %v273_v5, %v1503_v54  ;;  %v529_v46 = vsel %vm410_vm4, %v528_v42, %v527_v16  ;;  %v1050_v16 = vld [vmem:[%s1731_s4] ss:$0 sm:$0xff] }
 0x107   :  { %v355_v1 = vmul.f32 0.00390625, %v193_v45  ;;  %v516_v62 = vsel %vm414_vm5, %v515_v21, %v514_v26  ;;  %v541_v45 = vperm.slane %v1539_v50, %v1449_v28  ;;  %v540_v10 = vsel %vm402_vm2, %v539_v53, %v1497_v52 }
 0x108   :  { %v531_v60 = vsel %vm414_vm5, %v530_v36, %v529_v46 }
 0x109   :  { %v461_v17 = vperm.slane %v355_v1, %v1503_v54  ;;  %v542_v1 = vsel %vm406_vm3, %v541_v45, %v540_v10 }
 0x10b   :  { %v462_v49 = vsel %vm414_vm5, %v461_v17, %v460_v27 }
 0x10c   :  { %v315_v3 = vpop.xlane.xlu1 %314 }
 0x10d   :  { %v196_v47 = vpop.xlane.xlu2 %195 }
 0x10e   :  { %v294_v31 = vpop.xlane.xlu0 %293  ;;  %v356_v23 = vmul.f32 0.00390625, %v196_v47  ;;  %v554_v47 = vperm.slane %v1536_v41, %v1409_v22 }
 0x10f   :  { %v543_v7 = vperm.slane %v294_v31, %v1475_v19 }
 0x110   :  { %v463_v35 = vperm.slane %v356_v23, %v1525_v9  ;;  %v556_v23 = vperm.slane %v315_v3, %v1449_v28  ;;  %v555_v20 = vsel %vm402_vm2, %v554_v47, %v553_v51  ;;  %v1057_v51 = vld [vmem:[#allocation2 + $0x30] sm:$0xff] }
 0x111   :  { %v544_v15 = vsel %vm410_vm4, %v543_v7, %v542_v1 }
 0x112   :  { %v464_v55 = vsel %vm418_vm6, %v463_v35, %v462_v49  ;;  %v557_v35 = vsel %vm406_vm3, %v556_v23, %v555_v20  ;;  %v610_v49 = vld [vmem:[%s1730_s3] sm:$0xf]  ;;  %v1055_v23 = vld [vmem:[#allocation2 + $0x10] sm:$0xff] }
 0x113   :  { %v470_v4 = vsel %vm469_vm9, %v464_v55, %v468_v61  ;;  %1009 = vmatpush.msk.msra.mxu1 %vm571_vm13, %v610_v49  ;;  %v1630_v55 = vshrl.u32 %v389_v40, 7 }
 0x114   :  { %v276_v56 = vpop.xlane.xlu1 %275 }
 0x115   :  { %v532_v57 = vperm.slane %v276_v56, %v1525_v9  ;;  %v297_v5 = vpop.xlane.xlu2 %296  ;;  %1016 = vset.pattern.permute.xlu1 %v1630_v55  ;;  %v1634_v21 = vadd.s32 16, %v1630_v55  ;;  %v1645_v10 = vadd.s32 24, %v1630_v55  ;;  %v1648_v1 = vadd.s32 32, %v1630_v55 }
 0x116   :  { %v252_v43 = vpop.xlane.xlu0 %251  ;;  %v545_v48 = vperm.slane %v297_v5, %v1503_v54  ;;  %v1654_v2 = vadd.s32 48, %v1630_v55 }
 0x117   :  { %v517_v61 = vperm.slane %v252_v43, %v1525_v9  ;;  %v533_v34 = vsel %vm418_vm6, %v532_v57, %v531_v60  ;;  %1018 = vset.pattern.permute.xlu0 %v1634_v21 }
 0x118   :  { %v546_v31 = vsel %vm414_vm5, %v545_v48, %v544_v15  ;;  %v1657_v15 = vadd.s32 40, %v1630_v55 }
 0x119   :  { %v518_v0 = vsel %vm418_vm6, %v517_v61, %v516_v62 }
 0x11a   :  { %v565_v8 = vsel %vm564_vm10, %v533_v34, %v518_v0 }
 0x11c   :  { %v300_v6 = vpop.xlane.xlu1 %299 }
 0x11d   :  { %v547_v50 = vperm.slane %v300_v6, %v1525_v9  ;;  %v321_v25 = vpop.xlane.xlu2 %320 }
 0x11e   :  { %v318_v17 = vpop.xlane.xlu0 %317  ;;  %v560_v39 = vperm.slane %v321_v25, %v1503_v54  ;;  %v1049_v54 = vld [vmem:[%s1729_s2] ss:$0 sm:$0xff]  ;;  %s1162_s2 = smov [#allocation5]  }
 0x11f   :  { %v548_v52 = vsel %vm418_vm6, %v547_v50, %v546_v31  ;;  %v558_v24 = vperm.slane %v318_v17, %v1475_v19  ;;  %v1663_v50 = vadd.s32 56, %v1630_v55  ;;  %s993_s4 = sshll.u32 %s1162_s2, 4  ;;  %s994_s4 = int_to_ptr.vmem [resolvable:$true] %s993_s4 }
 0x120   :  { %v567_v27 = vsel %vm566_vm11, %v548_v52, %v565_v8 }
 0x121   :  { %v559_v22 = vsel %vm410_vm4, %v558_v24, %v557_v35  ;;  %v1056_v24 = vld [vmem:[#allocation2 + $0x18] sm:$0xff] }
 0x122   :  { %v561_v3 = vsel %vm414_vm5, %v560_v39, %v559_v22  ;;  %v1058_v35 = vld [vmem:[#allocation2 + $0x38] sm:$0xff] }
 0x126   :  { %v324_v41 = vpop.xlane.xlu0 %323 }
 0x127   :  { %v562_v28 = vperm.slane %v324_v41, %v1525_v9  ;;  %v1059_v41 = vld [vmem:[#allocation2 + $0x20] sm:$0xff] }
 0x129   :  { %v563_v19 = vsel %vm418_vm6, %v562_v28, %v561_v3  ;;  %v1060_v3 = vld [vmem:[#allocation2 + $0x28] sm:$0xff] }
 0x12a   :  { %v569_v42 = vsel %vm568_vm12, %v563_v19, %v567_v27 }
 0x12b   :  { %v572_v63 = vsel %vm571_vm13, %v470_v4, %v569_v42  ;;  %v1637_v4 = vadd.s32 8, %v1630_v55 }
 0x12c   :  { %1008 = vmatmul.msk.f32.vlgmr.msra.gmra.mxu0 %vm585_vm14, %v572_v63  ;;  %v1061_v63 = vld [vmem:[#allocation2] sm:$0xff] }
 0x12d   :  { %1017 = vset.pattern.permute.xlu2 %v1637_v4 }
 0x1a9   :  { %v606_v9 = vpop.f32.mrf.mxu0 }
 0x1aa   :  { %v607_v44 = vadd.f32 %v1049_v54, %v606_v9  ;;  %v1062_v54 = vld [vmem:[#allocation2 + $0x8] sm:$0xff] }
 0x1ac   :  { %v609_v36 = vmax.f32 %v607_v44, 0.0 }
 0x1ae   :  { %1010 = vmatmul.msk.f32.vlgmr.msra.gmra.mxu1 %vm615_vm15, %v609_v36 }
 0x22b   :  { %v639_v56 = vpop.f32.mrf.mxu1 }
 0x22c   :  { %v640_v18 = vadd.f32 %v1050_v16, %v639_v56  ;;  %v1063_v56 = vld [vmem:[#allocation2 + $0x90] sm:$0xff] }
 0x22e   :  { %v643_v40 = vrot.slane %v640_v18, 4 }
 0x230   :  { %v645_v46 = vadd.f32 %v643_v40, %v640_v18  ;;  %v1064_v40 = vld [vmem:[#allocation2 + $0x98] sm:$0xff] }
 0x232   :  { %v1011_v57 = vmul.f32 -1.442695, %v645_v46 }
 0x234   :  { %1051 = vpow2.f32 %v1011_v57 }
 0x23a   :  { %v1052_v43 = vpop.eup %1051 }
 0x23b   :  { %v649_v26 = vadd.f32 1.0, %v1052_v43  ;;  %v1065_v43 = vld [vmem:[#allocation2 + $0x40] sm:$0xff] }
 0x23d   :  { %1053 = vrcp.f32 %v649_v26  ;;  %v661_v53 = vand.u32 2147483648, %v649_v26  ;;  %v659_v34 = vand.u32 2147483647, %v649_v26  ;;  %vm655_vm1 = vweird.f32 %v649_v26 }
 0x23f   :  { %v662_v0 = vor.u32 1.1754944e-38, %v661_v53  ;;  %vm660_vm3 = vcmp.eq.f32.partialorder %v659_v34, 8.507059e+37 }
 0x243   :  { %v1054_v60 = vpop.eup %1053 }
 0x244   :  { %v651_v5 = vmul.f32 %v1054_v60, %v649_v26  ;;  %vm656_vm0 = vweird.f32 %v1054_v60 }
 0x245   :  { %vm657_vm2 = vmor %vm655_vm1, %vm656_vm0 }
 0x246   :  { %v652_v61 = vsub.f32 1.0, %v651_v5 }
 0x248   :  { %v653_v62 = vmul.f32 %v1054_v60, %v652_v61 }
 0x24a   :  { %v654_v45 = vadd.f32 %v1054_v60, %v653_v62 }
 0x24c   :  { %v658_v7 = vsel %vm657_vm2, %v1054_v60, %v654_v45  ;;  %v1066_v60 = vld [vmem:[#allocation2 + $0x48] sm:$0xff] }
 0x24d   :  { %v663_v8 = vsel %vm660_vm3, %v662_v0, %v658_v7 }
 0x24e   :  { %v665_v48 = vperm.slane %v663_v8, 0  ;;  %v714_v6 = vperm.slane %v663_v8, 1  ;;  %v1668_v17 = vperm.slane %v663_v8, 2  ;;  %v1674_v47 = vperm.slane %v663_v8, 3 }
 0x250   :  { %682 = vperm.xlu0 %1018, %v665_v48   ;;  %676 = vperm.xlu2 %1017, %v665_v48  }
 0x251   :  { %670 = vperm.xlu1 %1016, %v665_v48  }
 0x258   :  { %1025 = vset.pattern.permute.xlu0 %v1637_v4  ;;  %1019 = vset.pattern.permute.xlu2 %v1645_v10 }
 0x259   :  { %1020 = vset.pattern.permute.xlu1 %v1648_v1 }
 0x260   :  { %725 = vperm.xlu0 %1025, %v714_v6   ;;  %688 = vperm.xlu2 %1019, %v665_v48  }
 0x261   :  { %694 = vperm.xlu1 %1020, %v665_v48  }
 0x268   :  { %1030 = vset.pattern.permute.xlu0 %v1654_v2  ;;  %1021 = vset.pattern.permute.xlu2 %v1657_v15 }
 0x269   :  { %1022 = vset.pattern.permute.xlu1 %v1654_v2 }
 0x270   :  { %755 = vperm.xlu0 %1030, %v714_v6   ;;  %700 = vperm.xlu2 %1021, %v665_v48  }
 0x271   :  { %706 = vperm.xlu1 %1022, %v665_v48  }
 0x278   :  { %1035 = vset.pattern.permute.xlu0 %v1645_v10  ;;  %1023 = vset.pattern.permute.xlu2 %v1663_v50 }
 0x279   :  { %1024 = vset.pattern.permute.xlu1 %v1630_v55 }
 0x280   :  { %786 = vperm.xlu0 %1035, %v1668_v17   ;;  %712 = vperm.xlu2 %1023, %v665_v48   ;;  %v1068_v48 = vld [vmem:[#allocation2 + $0xa8] sm:$0xff] }
 0x281   :  { %719 = vperm.xlu1 %1024, %v714_v6  }
 0x288   :  { %1040 = vset.pattern.permute.xlu0 %v1630_v55  ;;  %1026 = vset.pattern.permute.xlu2 %v1634_v21 }
 0x289   :  { %1027 = vset.pattern.permute.xlu1 %v1645_v10 }
 0x290   :  { %817 = vperm.xlu0 %1040, %v1674_v47   ;;  %731 = vperm.xlu2 %1026, %v714_v6  }
 0x291   :  { %737 = vperm.xlu1 %1027, %v714_v6  }
 0x298   :  { %1045 = vset.pattern.permute.xlu0 %v1657_v15  ;;  %1028 = vset.pattern.permute.xlu2 %v1648_v1 }
 0x299   :  { %1029 = vset.pattern.permute.xlu1 %v1657_v15 }
 0x2a0   :  { %847 = vperm.xlu0 %1045, %v1674_v47   ;;  %743 = vperm.xlu2 %1028, %v714_v6  }
 0x2a1   :  { %749 = vperm.xlu1 %1029, %v714_v6  }
 0x2a8   :  { %1031 = vset.pattern.permute.xlu2 %v1663_v50  ;;  %1048 = vset.pattern.permute.xlu0 %v1663_v50 }
 0x2a9   :  { %1032 = vset.pattern.permute.xlu1 %v1630_v55 }
 0x2aa   :  { %v677_v31 = vpop.permute.xlu2 %676 }
 0x2ab   :  { %v863_v52 = vmul.f32 %v1055_v23, %v677_v31  ;;  %v864_v25 = vmul.f32 %v1056_v24, %v677_v31  ;;  %v1073_v24 = vld [vmem:[#allocation2 + $0xc0] sm:$0xff] }
 0x2ad   :  { %927 = vst [vmem:[#allocation5 + $0x10] sm:$0xff] %v863_v52 }
 0x2ae   :  { %928 = vst [vmem:[#allocation5 + $0x18] sm:$0xff] %v864_v25 }
 0x2b0   :  { %761 = vperm.xlu2 %1031, %v714_v6   ;;  %v1070_v6 = vld [vmem:[#allocation2 + $0x138] sm:$0xff] }
 0x2b1   :  { %768 = vperm.xlu1 %1032, %v1668_v17  }
 0x2b8   :  { %1033 = vset.pattern.permute.xlu2 %v1637_v4 }
 0x2b9   :  { %1034 = vset.pattern.permute.xlu1 %v1634_v21 }
 0x2ba   :  { %v689_v27 = vpop.permute.xlu2 %688 }
 0x2bb   :  { %v867_v20 = vmul.f32 %v1057_v51, %v689_v27  ;;  %v868_v39 = vmul.f32 %v1058_v35, %v689_v27  ;;  %v1074_v27 = vld [vmem:[#allocation2 + $0xc8] sm:$0xff]  ;;  %v1075_v35 = vld [vmem:[#allocation2 + $0x180] sm:$0xff] }
 0x2bd   :  { %931 = vst [vmem:[#allocation5 + $0x30] sm:$0xff] %v867_v20 }
 0x2be   :  { %932 = vst [vmem:[#allocation5 + $0x38] sm:$0xff] %v868_v39 }
 0x2c0   :  { %774 = vperm.xlu2 %1033, %v1668_v17  }
 0x2c1   :  { %780 = vperm.xlu1 %1034, %v1668_v17  }
 0x2c2   :  { %v683_v22 = vpop.permute.xlu0 %682 }
 0x2c3   :  { %v865_v28 = vmul.f32 %v1059_v41, %v683_v22  ;;  %v866_v19 = vmul.f32 %v1060_v3, %v683_v22  ;;  %v671_v42 = vpop.permute.xlu1 %670  ;;  %v1076_v22 = vld [vmem:[#allocation2 + $0x188] sm:$0xff] }
 0x2c4   :  { %v861_v49 = vmul.f32 %v1061_v63, %v671_v42  ;;  %v862_v9 = vmul.f32 %v1062_v54, %v671_v42 }
 0x2c5   :  { %929 = vst [vmem:[#allocation5 + $0x20] sm:$0xff] %v865_v28 }
 0x2c6   :  { %930 = vst [vmem:[#allocation5 + $0x28] sm:$0xff] %v866_v19 }
 0x2c7   :  { %925 = vst [vmem:[#allocation5] sm:$0xff] %v861_v49 }
 0x2c8   :  { %926 = vst [vmem:[#allocation5 + $0x8] sm:$0xff] %v862_v9  ;;  %1036 = vset.pattern.permute.xlu2 %v1648_v1 }
 0x2c9   :  { %1037 = vset.pattern.permute.xlu1 %v1657_v15 }
 0x2ca   :  { %v701_v44 = vpop.permute.xlu2 %700 }
 0x2cb   :  { %v871_v36 = vmul.f32 %v701_v44, %v1279_v58  ;;  %v872_v55 = vmul.f32 %v701_v44, %v1281_v59 }
 0x2cd   :  { %935 = vst [vmem:[#allocation5 + $0x50] sm:$0xff] %v871_v36 }
 0x2ce   :  { %936 = vst [vmem:[#allocation5 + $0x58] sm:$0xff] %v872_v55 }
 0x2d0   :  { %792 = vperm.xlu2 %1036, %v1668_v17  }
 0x2d1   :  { %798 = vperm.xlu1 %1037, %v1668_v17  }
 0x2d2   :  { %v726_v16 = vpop.permute.xlu0 %725 }
 0x2d3   :  { %v879_v18 = vmul.f32 %v1063_v56, %v726_v16  ;;  %v880_v46 = vmul.f32 %v1064_v40, %v726_v16  ;;  %v695_v57 = vpop.permute.xlu1 %694 }
 0x2d4   :  { %v869_v26 = vmul.f32 %v1065_v43, %v695_v57  ;;  %v870_v5 = vmul.f32 %v1066_v60, %v695_v57 }
 0x2d5   :  { %943 = vst [vmem:[#allocation5 + $0x90] sm:$0xff] %v879_v18  ;;  %v1082_v18 = vld [vmem:[#allocation2 + $0x118] sm:$0xff] }
 0x2d6   :  { %944 = vst [vmem:[#allocation5 + $0x98] sm:$0xff] %v880_v46 }
 0x2d7   :  { %933 = vst [vmem:[#allocation5 + $0x40] sm:$0xff] %v869_v26  ;;  %v1085_v26 = vld [vmem:[#allocation2 + $0x140] sm:$0xff] }
 0x2d8   :  { %934 = vst [vmem:[#allocation5 + $0x48] sm:$0xff] %v870_v5  ;;  %1038 = vset.pattern.permute.xlu2 %v1654_v2  ;;  %v1086_v5 = vld [vmem:[#allocation2 + $0x148] sm:$0xff] }
 0x2d9   :  { %1039 = vset.pattern.permute.xlu1 %v1663_v50 }
 0x2da   :  { %v713_v58 = vpop.permute.xlu2 %712 }
 0x2db   :  { %v875_v59 = vmul.f32 %v713_v58, %v1355_v32  ;;  %v876_v61 = vmul.f32 %v713_v58, %v1357_v33  ;;  %v1067_v33 = vld [vmem:[#allocation2 + $0xa0] sm:$0xff] }
 0x2dd   :  { %939 = vst [vmem:[#allocation5 + $0x70] sm:$0xff] %v875_v59 }
 0x2de   :  { %940 = vst [vmem:[#allocation5 + $0x78] sm:$0xff] %v876_v61  ;;  %v1087_v61 = vld [vmem:[#allocation2 + $0x120] sm:$0xff] }
 0x2e0   :  { %804 = vperm.xlu2 %1038, %v1668_v17  }
 0x2e1   :  { %810 = vperm.xlu1 %1039, %v1668_v17  }
 0x2e2   :  { %v756_v53 = vpop.permute.xlu0 %755 }
 0x2e3   :  { %v889_v62 = vmul.f32 %v756_v53, %v1317_v13  ;;  %v890_v34 = vmul.f32 %v756_v53, %v1319_v14  ;;  %v707_v45 = vpop.permute.xlu1 %706 }
 0x2e4   :  { %v873_v0 = vmul.f32 %v707_v45, %v1313_v11  ;;  %v874_v7 = vmul.f32 %v707_v45, %v1315_v12  ;;  %v1069_v12 = vld [vmem:[#allocation2 + $0x130] sm:$0xff] }
 0x2e5   :  { %953 = vst [vmem:[#allocation5 + $0xe0] sm:$0xff] %v889_v62  ;;  %v1088_v62 = vld [vmem:[#allocation2 + $0x128] sm:$0xff] }
 0x2e6   :  { %954 = vst [vmem:[#allocation5 + $0xe8] sm:$0xff] %v890_v34 }
 0x2e7   :  { %937 = vst [vmem:[#allocation5 + $0x60] sm:$0xff] %v873_v0  ;;  %v1089_v0 = vld [vmem:[#allocation2 + $0x160] sm:$0xff] }
 0x2e8   :  { %938 = vst [vmem:[#allocation5 + $0x68] sm:$0xff] %v874_v7  ;;  %1041 = vset.pattern.permute.xlu2 %v1637_v4  ;;  %v1071_v4 = vld [vmem:[#allocation2 + $0x80] sm:$0xff] }
 0x2e9   :  { %1042 = vset.pattern.permute.xlu1 %v1634_v21  ;;  %v1072_v21 = vld [vmem:[#allocation2 + $0x88] sm:$0xff] }
 0x2ea   :  { %v732_v32 = vpop.permute.xlu2 %731 }
 0x2eb   :  { %v881_v8 = vmul.f32 %v1067_v33, %v732_v32  ;;  %v882_v13 = vmul.f32 %v1068_v48, %v732_v32  ;;  %v1090_v32 = vld [vmem:[#allocation2 + $0x168] sm:$0xff]  ;;  %v1091_v48 = vld [vmem:[#allocation2 + $0x150] sm:$0xff] }
 0x2ed   :  { %945 = vst [vmem:[#allocation5 + $0xa0] sm:$0xff] %v881_v8 }
 0x2ee   :  { %946 = vst [vmem:[#allocation5 + $0xa8] sm:$0xff] %v882_v13 }
 0x2f0   :  { %823 = vperm.xlu2 %1041, %v1674_v47  }
 0x2f1   :  { %829 = vperm.xlu1 %1042, %v1674_v47  }
 0x2f2   :  { %v787_v11 = vpop.permute.xlu0 %786 }
 0x2f3   :  { %v899_v14 = vmul.f32 %v1069_v12, %v787_v11  ;;  %v900_v15 = vmul.f32 %v1070_v6, %v787_v11  ;;  %v720_v17 = vpop.permute.xlu1 %719  ;;  %v1092_v11 = vld [vmem:[#allocation2 + $0x158] sm:$0xff]  ;;  %v1093_v6 = vld [vmem:[#allocation2 + $0x190] sm:$0xff] }
 0x2f4   :  { %v877_v31 = vmul.f32 %v1071_v4, %v720_v17  ;;  %v878_v23 = vmul.f32 %v1072_v21, %v720_v17  ;;  %v1094_v17 = vld [vmem:[#allocation2 + $0x198] sm:$0xff]  ;;  %v1095_v21 = vld [vmem:[#allocation2 + $0x170] sm:$0xff] }
 0x2f5   :  { %963 = vst [vmem:[#allocation5 + $0x130] sm:$0xff] %v899_v14 }
 0x2f6   :  { %964 = vst [vmem:[#allocation5 + $0x138] sm:$0xff] %v900_v15 }
 0x2f7   :  { %941 = vst [vmem:[#allocation5 + $0x80] sm:$0xff] %v877_v31 }
 0x2f8   :  { %942 = vst [vmem:[#allocation5 + $0x88] sm:$0xff] %v878_v23  ;;  %1043 = vset.pattern.permute.xlu2 %v1645_v10  ;;  %v1077_v10 = vld [vmem:[#allocation2 + $0xb0] sm:$0xff] }
 0x2f9   :  { %1044 = vset.pattern.permute.xlu1 %v1648_v1  ;;  %v1078_v1 = vld [vmem:[#allocation2 + $0xb8] sm:$0xff] }
 0x2fa   :  { %v744_v52 = vpop.permute.xlu2 %743 }
 0x2fb   :  { %v885_v25 = vmul.f32 %v1073_v24, %v744_v52  ;;  %v886_v51 = vmul.f32 %v1074_v27, %v744_v52  ;;  %v1096_v52 = vld [vmem:[#allocation2 + $0x178] sm:$0xff]  ;;  %v1097_v27 = vld [vmem:[#allocation2 + $0x1b0] sm:$0xff] }
 0x2fd   :  { %949 = vst [vmem:[#allocation5 + $0xc0] sm:$0xff] %v885_v25 }
 0x2fe   :  { %950 = vst [vmem:[#allocation5 + $0xc8] sm:$0xff] %v886_v51 }
 0x300   :  { %835 = vperm.xlu2 %1043, %v1674_v47  }
 0x301   :  { %841 = vperm.xlu1 %1044, %v1674_v47  }
 0x302   :  { %v818_v20 = vpop.permute.xlu0 %817 }
 0x303   :  { %v909_v39 = vmul.f32 %v1075_v35, %v818_v20  ;;  %v910_v41 = vmul.f32 %v1076_v22, %v818_v20  ;;  %v738_v28 = vpop.permute.xlu1 %737  ;;  %v1098_v20 = vld [vmem:[#allocation2 + $0x1b8] sm:$0xff]  ;;  %v1099_v22 = vld [vmem:[#allocation2 + $0x1a0] sm:$0xff] }
 0x304   :  { %v883_v3 = vmul.f32 %v1077_v10, %v738_v28  ;;  %v884_v19 = vmul.f32 %v1078_v1, %v738_v28  ;;  %v1100_v28 = vld [vmem:[#allocation2 + $0x1a8] sm:$0xff]  ;;  %v1101_v1 = vld [vmem:[#allocation2 + $0x1e0] sm:$0xff] }
 0x305   :  { %973 = vst [vmem:[#allocation5 + $0x180] sm:$0xff] %v909_v39 }
 0x306   :  { %974 = vst [vmem:[#allocation5 + $0x188] sm:$0xff] %v910_v41 }
 0x307   :  { %947 = vst [vmem:[#allocation5 + $0xb0] sm:$0xff] %v883_v3 }
 0x308   :  { %948 = vst [vmem:[#allocation5 + $0xb8] sm:$0xff] %v884_v19  ;;  %1046 = vset.pattern.permute.xlu2 %v1654_v2  ;;  %v1079_v2 = vld [vmem:[#allocation2 + $0xd0] sm:$0xff] }
 0x309   :  { %1047 = vset.pattern.permute.xlu1 %v1663_v50  ;;  %v1080_v50 = vld [vmem:[#allocation2 + $0xd8] sm:$0xff] }
 0x30a   :  { %v762_v42 = vpop.permute.xlu2 %761 }
 0x30b   :  { %v891_v63 = vmul.f32 %v762_v42, %v1349_v29  ;;  %v892_v49 = vmul.f32 %v762_v42, %v1351_v30  ;;  %v1081_v30 = vld [vmem:[#allocation2 + $0x110] sm:$0xff]  ;;  %v1102_v42 = vld [vmem:[#allocation2 + $0x1e8] sm:$0xff] }
 0x30d   :  { %955 = vst [vmem:[#allocation5 + $0xf0] sm:$0xff] %v891_v63 }
 0x30e   :  { %956 = vst [vmem:[#allocation5 + $0xf8] sm:$0xff] %v892_v49 }
 0x310   :  { %853 = vperm.xlu2 %1046, %v1674_v47  }
 0x311   :  { %859 = vperm.xlu1 %1047, %v1674_v47  }
 0x312   :  { %v848_v54 = vpop.permute.xlu0 %847 }
 0x313   :  { %v919_v9 = vmul.f32 %v848_v54, %v1365_v37  ;;  %v920_v44 = vmul.f32 %v848_v54, %v1367_v38  ;;  %v750_v36 = vpop.permute.xlu1 %749  ;;  %v1083_v37 = vld [vmem:[#allocation2 + $0x100] sm:$0xff]  ;;  %v1084_v38 = vld [vmem:[#allocation2 + $0x108] sm:$0xff] }
 0x314   :  { %v887_v55 = vmul.f32 %v1079_v2, %v750_v36  ;;  %v888_v16 = vmul.f32 %v1080_v50, %v750_v36  ;;  %v1103_v54 = vld [vmem:[#allocation2 + $0x1c0] sm:$0xff] }
 0x315   :  { %983 = vst [vmem:[#allocation5 + $0x1d0] sm:$0xff] %v919_v9 }
 0x316   :  { %984 = vst [vmem:[#allocation5 + $0x1d8] sm:$0xff] %v920_v44  ;;  %v1104_v44 = vld [vmem:[#allocation2 + $0x1c8] sm:$0xff] }
 0x317   :  { %951 = vst [vmem:[#allocation5 + $0xd0] sm:$0xff] %v887_v55  ;;  %v1105_v55 = vld [vmem:[#allocation2 + $0x1f0] sm:$0xff] }
 0x318   :  { %952 = vst [vmem:[#allocation5 + $0xd8] sm:$0xff] %v888_v16  ;;  %v1106_v16 = vld [vmem:[#allocation2 + $0x1f8] sm:$0xff] }
 0x31a   :  { %v775_v29 = vpop.permute.xlu2 %774 }
 0x31b   :  { %v895_v56 = vmul.f32 %v1081_v30, %v775_v29  ;;  %v896_v40 = vmul.f32 %v1082_v18, %v775_v29 }
 0x31d   :  { %959 = vst [vmem:[#allocation5 + $0x110] sm:$0xff] %v895_v56 }
 0x31e   :  { %960 = vst [vmem:[#allocation5 + $0x118] sm:$0xff] %v896_v40 }
 0x323   :  { %v769_v47 = vpop.permute.xlu1 %768 }
 0x324   :  { %v893_v46 = vmul.f32 %v1083_v37, %v769_v47  ;;  %v894_v57 = vmul.f32 %v1084_v38, %v769_v47 }
 0x326   :  { %957 = vst [vmem:[#allocation5 + $0x100] sm:$0xff] %v893_v46 }
 0x327   :  { %958 = vst [vmem:[#allocation5 + $0x108] sm:$0xff] %v894_v57 }
 0x32a   :  { %v793_v43 = vpop.permute.xlu2 %792 }
 0x32b   :  { %v901_v60 = vmul.f32 %v1085_v26, %v793_v43  ;;  %v902_v58 = vmul.f32 %v1086_v5, %v793_v43 }
 0x32d   :  { %965 = vst [vmem:[#allocation5 + $0x140] sm:$0xff] %v901_v60 }
 0x32e   :  { %966 = vst [vmem:[#allocation5 + $0x148] sm:$0xff] %v902_v58 }
 0x333   :  { %v781_v59 = vpop.permute.xlu1 %780 }
 0x334   :  { %v897_v53 = vmul.f32 %v1087_v61, %v781_v59  ;;  %v898_v34 = vmul.f32 %v1088_v62, %v781_v59 }
 0x336   :  { %961 = vst [vmem:[#allocation5 + $0x120] sm:$0xff] %v897_v53 }
 0x337   :  { %962 = vst [vmem:[#allocation5 + $0x128] sm:$0xff] %v898_v34 }
 0x33a   :  { %v805_v45 = vpop.permute.xlu2 %804 }
 0x33b   :  { %v905_v7 = vmul.f32 %v1089_v0, %v805_v45  ;;  %v906_v33 = vmul.f32 %v1090_v32, %v805_v45 }
 0x33d   :  { %969 = vst [vmem:[#allocation5 + $0x160] sm:$0xff] %v905_v7 }
 0x33e   :  { %970 = vst [vmem:[#allocation5 + $0x168] sm:$0xff] %v906_v33 }
 0x343   :  { %v799_v8 = vpop.permute.xlu1 %798 }
 0x344   :  { %v903_v13 = vmul.f32 %v1091_v48, %v799_v8  ;;  %v904_v12 = vmul.f32 %v1092_v11, %v799_v8 }
 0x346   :  { %967 = vst [vmem:[#allocation5 + $0x150] sm:$0xff] %v903_v13 }
 0x347   :  { %968 = vst [vmem:[#allocation5 + $0x158] sm:$0xff] %v904_v12 }
 0x34a   :  { %v824_v14 = vpop.permute.xlu2 %823 }
 0x34b   :  { %v911_v15 = vmul.f32 %v1093_v6, %v824_v14  ;;  %v912_v4 = vmul.f32 %v1094_v17, %v824_v14 }
 0x34d   :  { %975 = vst [vmem:[#allocation5 + $0x190] sm:$0xff] %v911_v15 }
 0x34e   :  { %976 = vst [vmem:[#allocation5 + $0x198] sm:$0xff] %v912_v4 }
 0x353   :  { %v811_v31 = vpop.permute.xlu1 %810 }
 0x354   :  { %v907_v23 = vmul.f32 %v1095_v21, %v811_v31  ;;  %v908_v24 = vmul.f32 %v1096_v52, %v811_v31 }
 0x356   :  { %971 = vst [vmem:[#allocation5 + $0x170] sm:$0xff] %v907_v23 }
 0x357   :  { %972 = vst [vmem:[#allocation5 + $0x178] sm:$0xff] %v908_v24 }
 0x35a   :  { %v836_v25 = vpop.permute.xlu2 %835 }
 0x35b   :  { %v915_v51 = vmul.f32 %v1097_v27, %v836_v25  ;;  %v916_v35 = vmul.f32 %v1098_v20, %v836_v25 }
 0x35d   :  { %979 = vst [vmem:[#allocation5 + $0x1b0] sm:$0xff] %v915_v51 }
 0x35e   :  { %980 = vst [vmem:[#allocation5 + $0x1b8] sm:$0xff] %v916_v35 }
 0x363   :  { %v830_v39 = vpop.permute.xlu1 %829 }
 0x364   :  { %v913_v41 = vmul.f32 %v1099_v22, %v830_v39  ;;  %v914_v10 = vmul.f32 %v1100_v28, %v830_v39 }
 0x366   :  { %977 = vst [vmem:[#allocation5 + $0x1a0] sm:$0xff] %v913_v41 }
 0x367   :  { %978 = vst [vmem:[#allocation5 + $0x1a8] sm:$0xff] %v914_v10 }
 0x36a   :  { %v854_v3 = vpop.permute.xlu2 %853 }
 0x36b   :  { %v921_v19 = vmul.f32 %v1101_v1, %v854_v3  ;;  %v922_v63 = vmul.f32 %v1102_v42, %v854_v3 }
 0x36d   :  { %985 = vst [vmem:[#allocation5 + $0x1e0] sm:$0xff] %v921_v19 }
 0x36e   :  { %986 = vst [vmem:[#allocation5 + $0x1e8] sm:$0xff] %v922_v63 }
 0x373   :  { %v842_v49 = vpop.permute.xlu1 %841 }
 0x374   :  { %v917_v9 = vmul.f32 %v1103_v54, %v842_v49  ;;  %v918_v36 = vmul.f32 %v1104_v44, %v842_v49 }
 0x376   :  { %981 = vst [vmem:[#allocation5 + $0x1c0] sm:$0xff] %v917_v9 }
 0x377   :  { %982 = vst [vmem:[#allocation5 + $0x1c8] sm:$0xff] %v918_v36 }
 0x383   :  { %v860_v2 = vpop.permute.xlu1 %859 }
 0x384   :  { %v923_v50 = vmul.f32 %v1105_v55, %v860_v2  ;;  %v924_v29 = vmul.f32 %v1106_v16, %v860_v2 }
 0x386   :  { %987 = vst [vmem:[#allocation5 + $0x1f0] sm:$0xff] %v923_v50 }
 0x387   :  { %988 = vst [vmem:[#allocation5 + $0x1f8] sm:$0xff] %v924_v29 }
 0x388   :  { %1001 = dma.vmem_to_hbm [thread:$0]  %s994_s4, 8192, %s996_s21, [#allocation4], %s1160_s23, %s1160_s23, %s1161_s24  }
 0x389   :  { %1157 = dma.done.wait [#allocation4], 8192  }
 0x38a   :  { %1158 = vsyncadd [#allocation4], 4294959104 }
 0x38b   :  { %1006 = vsyncpa [#allocation3], 1 }
 0x38c   :  { %1007 = vsyncpa [#allocation4], 1 }

</bundles_post_ra>
